<compile_context>
chip_gen: v7x
topology: tpu7x:2x2x1
jax: 0.10.0
libtpu: 0.0.40
codegen_flags: <defaults>
</compile_context>

<pallas_src>
import functools

import jax
import jax.numpy as jnp
import numpy as np
from jax.experimental import pallas as pl
from jax.experimental.pallas import tpu as pltpu

BN_EPS = 1e-5
# Per-conv4-channel lane window handed to the FC stage: covers the valid 11x11
# block of the padded 13x13 grid (max valid lane 11*13+11 = 154), starts at
# lane 0, and 64*160 = 10240 is a multiple of 128 (lane-dense FC contraction).
FC_WIN = 160


def _vmem_limit_bytes():
    # Generation-aware scoped-VMEM limit: ~3/4 of physical, capped at 96 MiB
    # (v7x: 64 MiB physical -> 48 MiB; v5e/v6e: 128 MiB -> 96 MiB).
    try:
        cap = int(pltpu.get_tpu_info().vmem_capacity_bytes)
        return max(32 * 1024 * 1024, min(3 * cap // 4, 96 * 1024 * 1024))
    except Exception:
        return 32 * 1024 * 1024


VMEM_LIMIT = _vmem_limit_bytes()


# --------------------------------------------------------------------------
# Tiny setup probe: pin down pltpu.roll's rotation direction on this backend
# so the tap<->weight pairing in the conv kernel is unambiguous.
# --------------------------------------------------------------------------
def _roll_probe_kernel(x_ref, o_ref):
    o_ref[...] = pltpu.roll(x_ref[...], 1, axis=1)


def detect_roll_sign():
    """+1 if pltpu.roll matches jnp.roll semantics, -1 if it rotates the
    opposite way.  One tiny kernel, run once at setup."""
    x = jnp.tile(jnp.arange(128, dtype=jnp.float32), (8, 1))
    y = pl.pallas_call(
        _roll_probe_kernel,
        out_shape=jax.ShapeDtypeStruct((8, 128), jnp.float32),
    )(x)
    v = float(jax.device_get(y)[0, 0])
    return 1 if abs(v - 127.0) < 0.5 else -1


# --------------------------------------------------------------------------
# One-time host-side parameter preparation: BN fold, block-banded tap-major
# conv weights, fc1 scatter into the conv4 output layout, bf16 casts.
# --------------------------------------------------------------------------
def _fold_bn(w, b, gamma, beta, mean, var):
    w = np.asarray(w, np.float32)
    b = np.asarray(b, np.float32)
    gamma = np.asarray(gamma, np.float32)
    beta = np.asarray(beta, np.float32)
    mean = np.asarray(mean, np.float32)
    var = np.asarray(var, np.float32)
    scale = gamma / np.sqrt(var + BN_EPS)
    wf = w * scale.reshape((-1,) + (1,) * (w.ndim - 1))
    bf = (b - mean) * scale + beta
    return wf, bf


def _band3d(wf, d_in):
    """Folded Conv3d weight [Cout,Cin,kd,3,3] -> [Cout*Dout, 9*Cin*Din] banded
    matrix, tap blocks in (dy, dx) order.  Activation row r = ci*Din + d,
    output row q = co*Dout + do."""
    cout, cin, kd, kh, kw = wf.shape
    d_out = d_in - kd + 1
    blocks = []
    for dy in range(kh):
        for dx in range(kw):
            m = np.zeros((cout, d_out, cin, d_in), np.float32)
            for do in range(d_out):
                m[:, do, :, do:do + kd] = wf[:, :, :, dy, dx]
            blocks.append(m.reshape(cout * d_out, cin * d_in))
    return np.concatenate(blocks, axis=1), d_out


def _band2d(wf):
    cout, cin, kh, kw = wf.shape
    blocks = [wf[:, :, dy, dx] for dy in range(kh) for dx in range(kw)]
    return np.concatenate(blocks, axis=1)  # [Cout, 9*Cin]


def prepare_params(raw, bandnum, h=11, w=11):
    hp_, wp_ = h + 2, w + 2
    npos = hp_ * wp_
    slab = ((npos + 127) // 128) * 128
    assert h * wp_ + w < FC_WIN <= slab
    out = {}

    # valid-position lane mask (shared by all conv layers; also kills the
    # wrap-around garbage of the in-kernel rolls, so nothing non-finite or
    # non-zero ever reaches a padding position or the fc1 contraction)
    mask = np.zeros((1, slab), np.float32)
    for hh in range(1, h + 1):
        for ww in range(1, w + 1):
            mask[0, hh * wp_ + ww] = 1.0
    out["mask"] = jnp.asarray(mask)

    w1f, b1f = _fold_bn(*raw["conv1"])
    w2f, b2f = _fold_bn(*raw["conv2"])
    w3f, b3f = _fold_bn(*raw["conv3"])
    w4f, b4f = _fold_bn(*raw["conv4"])

    wc1, d1 = _band3d(w1f, bandnum)
    wc2, d2 = _band3d(w2f, d1)
    wc3, d3 = _band3d(w3f, d2)
    wc4 = _band2d(w4f)
    assert w4f.shape[1] == w3f.shape[0] * d3  # merged channel index = c*D + d

    out["wc1"] = jnp.asarray(wc1, jnp.bfloat16)
    out["bc1"] = jnp.asarray(np.repeat(b1f, d1)[:, None], jnp.float32)
    out["wc2"] = jnp.asarray(wc2, jnp.bfloat16)
    out["bc2"] = jnp.asarray(np.repeat(b2f, d2)[:, None], jnp.float32)
    out["wc3"] = jnp.asarray(wc3, jnp.bfloat16)
    out["bc3"] = jnp.asarray(np.repeat(b3f, d3)[:, None], jnp.float32)
    out["wc4"] = jnp.asarray(wc4, jnp.bfloat16)
    out["bc4"] = jnp.asarray(b4f[:, None], jnp.float32)

    # fc1: scatter the [256, 64*11*11] torch weight into the kernel's conv4
    # output layout (feature index = c*FC_WIN + hp*Wp + wp); zero rows elsewhere.
    w1, b1 = raw["fc1"]
    w1 = np.asarray(w1, np.float32)
    c4 = w4f.shape[0]
    assert w1.shape[1] == c4 * h * w, "fc1 expects a %dx%d spatial patch" % (h, w)
    pos = (np.arange(1, h + 1)[:, None] * wp_ + np.arange(1, w + 1)[None, :]).reshape(-1)
    rows = (np.arange(c4)[:, None] * FC_WIN + pos[None, :]).reshape(-1)
    w1r = np.zeros((c4 * FC_WIN, w1.shape[0]), np.float32)
    w1r[rows, :] = w1.T
    out["fw1"] = jnp.asarray(w1r, jnp.bfloat16)
    out["fb1"] = jnp.asarray(np.asarray(b1, np.float32)[None, :])
    w2, b2 = raw["fc2"]
    out["fw2"] = jnp.asarray(np.asarray(w2, np.float32).T, jnp.bfloat16)
    out["fb2"] = jnp.asarray(np.asarray(b2, np.float32)[None, :])
    w3, b3 = raw["cls"]
    out["fw3"] = jnp.asarray(np.asarray(w3, np.float32).T, jnp.bfloat16)
    out["fb3"] = jnp.asarray(np.asarray(b3, np.float32)[None, :])
    return out


# --------------------------------------------------------------------------
# Pallas call 1: the whole conv stack, one sample per grid step.
# --------------------------------------------------------------------------
def _conv_stack(a0, wc1, bc1, wc2, bc2, wc3, bc3, wc4, bc4, mask,
                *, wp, fc_win, roll_sign):
    n, cd, slab = a0.shape
    c4 = wc4.shape[0]

    # lane shift for tap (dy, dx): shifted[l] = a[l + (dy-1)*Wp + (dx-1)]
    shifts = []
    for dy in range(3):
        for dx in range(3):
            s = (dy - 1) * wp + (dx - 1)
            shifts.append((-s * roll_sign) % slab)

    def kernel(x_ref, w1_ref, b1_ref, w2_ref, b2_ref, w3_ref, b3_ref,
               w4_ref, b4_ref, m_ref, o_ref):
        msk = m_ref[...]                                     # [1, slab] f32

        def layer(a, w_ref, b_ref):
            # 9 spatial taps as lane rotations, stacked on sublanes, then one
            # banded matmul (spectral taps are inside the weight's band).
            taps = [a if sh == 0 else pltpu.roll(a, sh, axis=1) for sh in shifts]
            cols = jnp.concatenate(taps, axis=0)             # [9*Cin*Din, slab]
            acc = jnp.dot(w_ref[...], cols,
                          preferred_element_type=jnp.float32)
            act = jnp.maximum(acc + b_ref[...], 0.0) * msk   # ReLU + zero padding ring
            return act.astype(jnp.bfloat16)

        a = x_ref[0]                                         # [Cin*D, slab]
        a = layer(a, w1_ref, b1_ref)                         # conv1 + BN + ReLU
        a = layer(a, w2_ref, b2_ref)                         # conv2
        a = layer(a, w3_ref, b3_ref)                         # conv3 (rows = c*D+d == torch reshape)
        a = layer(a, w4_ref, b4_ref)                         # conv4 (2-D), [64, slab]
        o_ref[0] = a[:, :fc_win]                             # aligned-start window

    res = lambda shape: pl.BlockSpec(shape, lambda i: (0, 0))  # resident block
    return pl.pallas_call(
        kernel,
        out_shape=jax.ShapeDtypeStruct((n, c4, fc_win), jnp.bfloat16),
        grid=(n,),
        in_specs=[
            pl.BlockSpec((1, cd, slab), lambda i: (i, 0, 0)),   # per-sample input
            res(wc1.shape), res(bc1.shape),
            res(wc2.shape), res(bc2.shape),
            res(wc3.shape), res(bc3.shape),
            res(wc4.shape), res(bc4.shape),
            res(mask.shape),
        ],
        out_specs=pl.BlockSpec((1, c4, fc_win), lambda i: (i, 0, 0)),
        compiler_params=pltpu.CompilerParams(
            dimension_semantics=("parallel",),    # >=2 steps -> v7x megacore
            vmem_limit_bytes=VMEM_LIMIT,
        ),
    )(a0, wc1, bc1, wc2, bc2, wc3, bc3, wc4, bc4, mask)


# --------------------------------------------------------------------------
# Pallas call 2: fc1 -> ReLU -> fc2 -> ReLU -> classifier, weights resident.
# --------------------------------------------------------------------------
def _fc_fused(feat, w1, b1, w2, b2, w3, b3):
    n, k = feat.shape
    ncls = w3.shape[1]

    def kernel(x_ref, w1_ref, b1_ref, w2_ref, b2_ref, w3_ref, b3_ref, o_ref):
        a = jnp.dot(x_ref[...], w1_ref[...], preferred_element_type=jnp.float32)
        a = jnp.maximum(a + b1_ref[...], 0.0)
        # TODO(synk): Dropout(p=0.4) after FC1/FC2 is eval-mode identity only.
        a = jnp.dot(a.astype(jnp.bfloat16), w2_ref[...],
                    preferred_element_type=jnp.float32)
        a = jnp.maximum(a + b2_ref[...], 0.0)
        a = jnp.dot(a.astype(jnp.bfloat16), w3_ref[...],
                    preferred_element_type=jnp.float32) + b3_ref[...]
        o_ref[...] = a                      # tiny [N, classes] store; kept natural

    full = lambda shape: pl.BlockSpec(shape, lambda i: (0, 0))
    return pl.pallas_call(
        kernel,
        out_shape=jax.ShapeDtypeStruct((n, ncls), jnp.float32),
        grid=(1,),
        in_specs=[full(feat.shape), full(w1.shape), full(b1.shape),
                  full(w2.shape), full(b2.shape), full(w3.shape), full(b3.shape)],
        out_specs=pl.BlockSpec((n, ncls), lambda i: (0, 0)),
        compiler_params=pltpu.CompilerParams(
            dimension_semantics=("arbitrary",),
            vmem_limit_bytes=VMEM_LIMIT,
        ),
    )(feat, w1, b1, w2, b2, w3, b3)


# --------------------------------------------------------------------------
# HybridSN forward
# --------------------------------------------------------------------------
def hybridsn_forward(prepared, x, *, roll_sign=1):
    if x.ndim < 5:
        x = x[:, None]                                       # [N, 1, D, H, W]
    n, cin, d, h, w = x.shape
    hp, wp = h + 2, w + 2
    npos = hp * wp
    slab = prepared["mask"].shape[1]

    # Channel-major, spatially padded, lane-flattened layout (tiny, one XLA op).
    xpad = jnp.pad(x.astype(jnp.bfloat16),
                   ((0, 0), (0, 0), (0, 0), (1, 1), (1, 1)))
    a0 = xpad.reshape(n, cin * d, npos)
    a0 = jnp.pad(a0, ((0, 0), (0, 0), (0, slab - npos)))

    conv4 = _conv_stack(a0, prepared["wc1"], prepared["bc1"],
                        prepared["wc2"], prepared["bc2"],
                        prepared["wc3"], prepared["bc3"],
                        prepared["wc4"], prepared["bc4"], prepared["mask"],
                        wp=wp, fc_win=FC_WIN, roll_sign=roll_sign)

    feat = conv4.reshape(n, conv4.shape[1] * FC_WIN)   # free row-major collapse
    return _fc_fused(feat, prepared["fw1"], prepared["fb1"],
                     prepared["fw2"], prepared["fb2"],
                     prepared["fw3"], prepared["fb3"])


# --------------------------------------------------------------------------
# Plain-JAX float32 reference (mirrors the PyTorch module, eval-mode BN).
# --------------------------------------------------------------------------
def reference_forward(raw, x):
    x = jnp.asarray(x, jnp.float32)
    if x.ndim < 5:
        x = x[:, None]

    def bn(y, gamma, beta, mean, var):
        shape = (1, -1) + (1,) * (y.ndim - 2)
        s = gamma / jnp.sqrt(var + BN_EPS)
        return (y - mean.reshape(shape)) * s.reshape(shape) + beta.reshape(shape)

    def conv3d_block(y, p):
        w, b, g, bt, mu, var = [jnp.asarray(v, jnp.float32) for v in p]
        y = jax.lax.conv_general_dilated(
            y, w, window_strides=(1, 1, 1), padding=[(0, 0), (1, 1), (1, 1)],
            dimension_numbers=("NCDHW", "OIDHW", "NCDHW"))
        y = y + b.reshape(1, -1, 1, 1, 1)
        return jnp.maximum(bn(y, g, bt, mu, var), 0.0)

    y = conv3d_block(x, raw["conv1"])
    y = conv3d_block(y, raw["conv2"])
    y = conv3d_block(y, raw["conv3"])
    n = y.shape[0]
    y = y.reshape(n, -1, y.shape[3], y.shape[4])
    w, b, g, bt, mu, var = [jnp.asarray(v, jnp.float32) for v in raw["conv4"]]
    y = jax.lax.conv_general_dilated(
        y, w, window_strides=(1, 1), padding=[(1, 1), (1, 1)],
        dimension_numbers=("NCHW", "OIHW", "NCHW"))
    y = y + b.reshape(1, -1, 1, 1)
    y = jnp.maximum(bn(y, g, bt, mu, var), 0.0)
    y = y.reshape(n, -1)
    w1, b1 = raw["fc1"]
    y = jnp.maximum(y @ jnp.asarray(w1).T + jnp.asarray(b1), 0.0)
    w2, b2 = raw["fc2"]
    y = jnp.maximum(y @ jnp.asarray(w2).T + jnp.asarray(b2), 0.0)
    w3, b3 = raw["cls"]
    return y @ jnp.asarray(w3).T + jnp.asarray(b3)


# --------------------------------------------------------------------------
# Deterministic parameter init (shapes per HybridSN.__init__)
# --------------------------------------------------------------------------
def init_params(key, input_channels, bandnum, classes):
    ks = iter(jax.random.split(key, 32))

    def conv_bn(cout, wshape):
        return (
            0.05 * jax.random.normal(next(ks), wshape, jnp.float32),        # weight
            0.05 * jax.random.normal(next(ks), (cout,), jnp.float32),       # bias
            1.0 + 0.1 * jax.random.normal(next(ks), (cout,), jnp.float32),  # gamma
            0.1 * jax.random.normal(next(ks), (cout,), jnp.float32),        # beta
            0.05 * jax.random.normal(next(ks), (cout,), jnp.float32),       # running_mean
            0.5 + jax.random.uniform(next(ks), (cout,), jnp.float32),       # running_var
        )

    def lin(out_f, in_f, std):
        return (std * jax.random.normal(next(ks), (out_f, in_f), jnp.float32),
                0.02 * jax.random.normal(next(ks), (out_f,), jnp.float32))

    return {
        "conv1": conv_bn(8, (8, input_channels, 7, 3, 3)),
        "conv2": conv_bn(16, (16, 8, 5, 3, 3)),
        "conv3": conv_bn(32, (32, 16, 3, 3, 3)),
        "conv4": conv_bn(64, (64, 32 * (bandnum - 12), 3, 3)),
        "fc1": lin(256, 7744, 0.03),   # 7744 = 64*11*11 -> 11x11 spatial patch
        "fc2": lin(128, 256, 0.06),
        "cls": lin(classes, 128, 0.15),
    }


if __name__ == "__main__":
    # Linear(7744, 256) forces H = W = 11; bandnum must exceed 12 so the
    # spectral dim survives the three 3-D convs.
    batch, input_channels, bandnum, classes = 2, 1, 16, 4
    H = W = 11

    key = jax.random.PRNGKey(0)
    pkey, xkey = jax.random.split(key)
    raw = init_params(pkey, input_channels, bandnum, classes)
    prepared = prepare_params(raw, bandnum, H, W)       # fold/band/remap/cast ONCE
    x = jax.random.normal(xkey, (batch, bandnum, H, W), jnp.float32)

    roll_sign = detect_roll_sign()                      # pin down rotate direction
    fwd = jax.jit(functools.partial(hybridsn_forward, roll_sign=roll_sign))
    out = jax.block_until_ready(fwd(prepared, x))

    assert out.shape == (batch, classes), out.shape
    assert bool(jnp.all(jnp.isfinite(out)))
    ref = reference_forward(raw, x)
    err = float(jnp.max(jnp.abs(out - ref)))
    tol = 0.05 + 0.1 * float(jnp.max(jnp.abs(ref)))     # bf16 weights/activations
    assert err <= tol, "max |out-ref| = %.4f > tol %.4f" % (err, tol)
    print("KERNEL_OK")
</pallas_src>

<mosaic_0001>
module attributes {stable_mosaic.version = 11 : i64} {
  func.func @_roll_probe_kernel(%arg0: memref<8x128xf32, #tpu.memory_space<vmem>>, %arg1: memref<8x128xf32, #tpu.memory_space<vmem>>) attributes {dimension_semantics = [], scalar_prefetch = 0 : i64, scratch_operands = 0 : i64, tpu.core_type = #tpu.core_type<tc>} {
    %c0 = arith.constant 0 : index
    %c0_0 = arith.constant 0 : index
    %0 = vector.load %arg0[%c0, %c0_0] : memref<8x128xf32, #tpu.memory_space<vmem>>, vector<8x128xf32>
    %c1_i32 = arith.constant 1 : i32
    %1 = tpu.dynamic_rotate %0 by %c1_i32 dim 1 : vector<8x128xf32>, i32 -> vector<8x128xf32>
    %c0_1 = arith.constant 0 : index
    %c0_2 = arith.constant 0 : index
    %2 = vector.load %arg1[%c0_1, %c0_2] : memref<8x128xf32, #tpu.memory_space<vmem>>, vector<8x128xf32>
    tpu.vector_store %arg1[%c0_1, %c0_2], %1 {strides = array<i32>} : memref<8x128xf32, #tpu.memory_space<vmem>>, vector<8x128xf32>,
    return
  }
}

</mosaic_0001>

<bundles_post_ra>
// kernel: tpu_custom_call.1
= control target key start
LH: loop header
LB: loop body
LE: loop exit
PB: predicated region body
PF: predicated region fallthrough
CT: control target
= control target key end

     0   :  { %6 = vsyncpa [#allocation3], 0  ;;  %s128_s0 = inlined_call_operand.hbm [shape: f32[8,128], index: 0, kind: input, shape index: {}]   ;;  %s129_s1 = inlined_call_operand.hbm [shape: f32[8,128], index: 1, kind: output, shape index: {}]  }
   0x1   :  { %7 = vsyncpa [#allocation4], 0  ;;  %s91_s6 = smov [#allocation2]   ;;  %s43_s10 = scalar_lea.hbm %s128_s0, 128 }
   0x2   :  { %s14_s7 = sshll.u32 %s91_s6, 4  ;;  %p44_p0 = scmp.ne.s32.totalorder %s128_s0, %s43_s10  ;;  %s15_s7 = int_to_ptr.vmem [resolvable:$true] %s14_s7 }
   0x3   :  { %p47_p1 = scmp.lt.u32.totalorder %s43_s10, %s128_s0 }
   0x5   :  { %p49_p2 = pnand %p47_p1, %p44_p0 }
   0x7   :  { %52 = shalt.err (!%p49_p2)
}
   0x8   :  { %s53_s15 = scalar_lea.vmem %s15_s7, 128  ;;  %p58_p4 = scmp.lt.s32.totalorder %s15_s7, %s15_s7 }
   0x9   :  { %p54_p3 = scmp.ne.s32.totalorder %s15_s7, %s53_s15  ;;  %p59_p5 = scmp.lt.s32.totalorder %s53_s15, %s53_s15 }
   0xb   :  { %p60_p6 = por %p59_p5, %p58_p4 }
   0xd   :  { %p61_p7 = pnand %p60_p6, %p54_p3 }
   0xf   :  { %64 = shalt.err (!%p61_p7)
}
  0x10   :  { %17 = dma.hbm_to_vmem [thread:$0]  %s128_s0, 128, %s15_s7, [#allocation3]  }
  0x11   :  { %87 = dma.done.wait [#allocation3], 128  }
  0x12   :  { %88 = vsyncadd [#allocation3], 4294967168  ;;  %v21_v0 = vld [vmem:[#allocation2] sm:$0xff]  ;;  %s92_s18 = smov 1   ;;  %s93_s19 = smov [#allocation5]  }
  0x13   :  { %22 = vrot.lane.b32.xlu0 %v21_v0, %s92_s18  ;;  %s31_s20 = sshll.u32 %s93_s19, 4  ;;  %s32_s20 = int_to_ptr.vmem [resolvable:$true] %s31_s20 }
  0x14   :  { %s65_s21 = scalar_lea.vmem %s32_s20, 128  ;;  %p70_p9 = scmp.lt.s32.totalorder %s32_s20, %s32_s20 }
  0x15   :  { %p66_p8 = scmp.ne.s32.totalorder %s32_s20, %s65_s21  ;;  %p71_p10 = scmp.lt.s32.totalorder %s65_s21, %s65_s21 }
  0x17   :  { %p72_p11 = por %p71_p10, %p70_p9 }
  0x19   :  { %p73_p12 = pnand %p72_p11, %p66_p8 }
  0x85   :  { %v23_v1 = vpop.permute.xlu0 %22 }
  0x86   :  { %24 = vst [vmem:[#allocation5] sm:$0xff] %v23_v1 }
  0x87   :  { %76 = shalt.err (!%p73_p12)
}
  0x88   :  { %s77_s0 = scalar_lea.hbm %s129_s1, 128 }
  0x89   :  { %p78_p13 = scmp.ne.s32.totalorder %s129_s1, %s77_s0  ;;  %p81_p0 = scmp.lt.u32.totalorder %s77_s0, %s129_s1 }
  0x8b   :  { %p83_p1 = pnand %p81_p0, %p78_p13 }
  0x8d   :  { %86 = shalt.err (!%p83_p1)
}
  0x8e   :  { %34 = dma.vmem_to_hbm [thread:$0]  %s32_s20, 128, %s129_s1, [#allocation4]  }
  0x8f   :  { %89 = dma.done.wait [#allocation4], 128  }
  0x90   :  { %90 = vsyncadd [#allocation4], 4294967168 }
  0x91   :  { %38 = vsyncpa [#allocation3], 1 }
  0x92   :  { %39 = vsyncpa [#allocation4], 1 }

</bundles_post_ra>
